<compile_context>
chip_gen: v5e
topology: v5e:2x2
jax: 0.10.0
libtpu: 0.0.40
codegen_flags: <defaults>
</compile_context>

<pallas_src>
import jax
import jax.numpy as jnp
import numpy as np
from jax.experimental import pallas as pl
from jax.experimental.pallas import tpu as pltpu

# ---- small synthetic config (stands in for cfg.TRAIN.*) ----------------------
B, N = 2, 64            # batch, points per cloud
G = 32                  # cfg.TRAIN.LEN_GLOBAL
NUM_COARSE = 16         # cfg.TRAIN.NUM_COARSE
GRID_SIZE = 2           # cfg.TRAIN.GRID_SIZE
GRID_SCALE = 0.05       # cfg.TRAIN.GRID_SCALE
S = GRID_SIZE * GRID_SIZE
NUM_FINE = NUM_COARSE * S
NUM_CLASSES = 8
H1, H2 = 64, 128        # encoder point-wise MLP widths
HC = 64                 # coarse-MLP hidden
HF = 64                 # folding-MLP hidden
HK = 64                 # classifier hidden
HEADS = NUM_COARSE * 3 + NUM_CLASSES   # fused coarse_flat | pred output slab width


# ---- BlockSpec helpers --------------------------------------------------------
def full_spec(shape):
    """Whole array as one block (weights / constants), same block for every grid step."""
    nd = len(shape)
    return pl.BlockSpec(shape, lambda b, _nd=nd: (0,) * _nd)


def batch_spec(trailing_shape):
    """Per-batch block: block = (1, *trailing), indexed by the batch grid axis."""
    nd = len(trailing_shape)
    return pl.BlockSpec((1,) + tuple(trailing_shape),
                        lambda b, _nd=nd: (b,) + (0,) * _nd)


_PPARAMS = pltpu.CompilerParams(dimension_semantics=("parallel",))


# ---- kernels ------------------------------------------------------------------
def head_kernel(pc_ref, ew1, eb1, ew2, eb2, ew3, eb3, wh1, bh1, wh2, bh2,
                heads_ref, gh_ref):
    """Fused: encoder + coarse head + classifier head + global folding term.

    heads_ref : (1, 1, HEADS)  = [coarse_flat (NUM_COARSE*3) | pred (NUM_CLASSES)]
    gh_ref    : (1, 1, HF)     = global_feature @ f_wgl  (consumed by fine_kernel)
    """
    x = pc_ref[0]                                                         # (N, 3)
    # encoder point-wise MLP
    h = jnp.maximum(jnp.dot(x, ew1[...], preferred_element_type=jnp.float32) + eb1[...], 0.0)
    h = jnp.maximum(jnp.dot(h, ew2[...], preferred_element_type=jnp.float32) + eb2[...], 0.0)
    h = jnp.dot(h, ew3[...], preferred_element_type=jnp.float32) + eb3[...]  # (N, G)
    # TODO(synk): at production point counts (N >= 2048) tile N as an "arbitrary" grid axis
    # with a running-max accumulator instead of a single (N, H2) block.
    g = jnp.max(h, axis=0, keepdims=True)                                 # (1, G) global feature

    # one packed matmul replaces coarse-hidden / classifier-hidden / global-fold matmuls
    t = jnp.dot(g, wh1[...], preferred_element_type=jnp.float32) + bh1[...]  # (1, HC+HK+HF)
    u = jnp.maximum(t[:, :HC + HK], 0.0)      # relu only on the two MLP hiddens
    gh_ref[0] = t[:, HC + HK:]                # (1, HF) fold term, no relu

    # one block-diagonal matmul replaces coarse-out / classifier-out matmuls
    heads_ref[0] = jnp.dot(u, wh2[...], preferred_element_type=jnp.float32) + bh2[...]


def fine_kernel(coarse_ref, gh_ref, fold_ref, rep_ref, wp, w2, b2, w3, b3, out_ref):
    coarse = coarse_ref[0]                                                # (NUM_COARSE, 3)
    # repeat each coarse center S times via a 0/1 matmul (MXU-friendly, no in-kernel reshape)
    # TODO(synk): at production sizes (NUM_FINE ~16k, NUM_COARSE ~1k) replace the dense one-hot
    # `rep` matmul with an in-kernel sublane repeat / NUM_FINE grid tiling (VMEM footprint).
    pt = jnp.dot(rep_ref[...], coarse, preferred_element_type=jnp.float32)    # (NUM_FINE, 3)
    # fold_ref already contains grid2 @ f_wg + f_b1 (hoisted constant); gh is g @ f_wgl
    h = fold_ref[...] + jnp.dot(pt, wp[...], preferred_element_type=jnp.float32) + gh_ref[0]
    h = jnp.maximum(h, 0.0)
    h = jnp.maximum(jnp.dot(h, w2[...], preferred_element_type=jnp.float32) + b2[...], 0.0)
    off = jnp.dot(h, w3[...], preferred_element_type=jnp.float32) + b3[...]   # (NUM_FINE, 3)
    # TODO(synk): at production sizes emit this lane-dense (e.g. (1, NUM_FINE*3)) to avoid
    # masked last-dim-3 stores; negligible at this toy size.
    out_ref[0] = off + pt


# ---- wrapper-side constant / weight packing -----------------------------------
def make_fold_constants():
    lin = jnp.linspace(-GRID_SCALE, GRID_SCALE, GRID_SIZE, dtype=jnp.float32)
    gx, gy = jnp.meshgrid(lin, lin, indexing="ij")
    grid_base = jnp.stack([gx.ravel(), gy.ravel()], axis=-1)              # (S, 2)
    grid2 = jnp.tile(grid_base, (NUM_COARSE, 1))                          # (NUM_FINE, 2)
    rep = jnp.repeat(jnp.eye(NUM_COARSE, dtype=jnp.float32), S, axis=0)   # (NUM_FINE, NUM_COARSE)
    return grid2, rep


def prepare_params(params, grid2, rep):
    """One-time packing (all plain JAX, outside the kernels)."""
    # hoisted folding constant: grid2 @ f_wg + f_b1
    fold_const = grid2 @ params["f_wg"] + params["f_b1"]                  # (NUM_FINE, HF)

    # pack the three (G -> *) head matmuls into one (G, HC+HK+HF) matrix
    W_h1 = jnp.concatenate([params["c_w1"], params["k_w1"], params["f_wgl"]], axis=1)
    b_h1 = jnp.concatenate([params["c_b1"], params["k_b1"],
                            jnp.zeros((1, HF), jnp.float32)], axis=1)

    # block-diagonal packing of the two head output layers
    W_h2 = jnp.zeros((HC + HK, HEADS), jnp.float32)
    W_h2 = W_h2.at[:HC, :NUM_COARSE * 3].set(params["c_w2"])
    W_h2 = W_h2.at[HC:, NUM_COARSE * 3:].set(params["k_w2"])
    b_h2 = jnp.concatenate([params["c_b2"], params["k_b2"]], axis=1)

    return {
        "e_w1": params["e_w1"], "e_b1": params["e_b1"],
        "e_w2": params["e_w2"], "e_b2": params["e_b2"],
        "e_w3": params["e_w3"], "e_b3": params["e_b3"],
        "W_h1": W_h1, "b_h1": b_h1, "W_h2": W_h2, "b_h2": b_h2,
        "f_wp": params["f_wp"], "f_w2": params["f_w2"], "f_b2": params["f_b2"],
        "f_w3": params["f_w3"], "f_b3": params["f_b3"],
        "fold_const": fold_const, "rep": rep,
    }


# ---- forward ------------------------------------------------------------------
def trans_forward(pc, prep):
    bsz = pc.shape[0]

    # stage 1: encoder + coarse head + classifier head + fold term  (one launch, grid=(B,))
    heads, gh = pl.pallas_call(
        head_kernel,
        out_shape=(jax.ShapeDtypeStruct((bsz, 1, HEADS), jnp.float32),
                   jax.ShapeDtypeStruct((bsz, 1, HF), jnp.float32)),
        grid=(bsz,),
        in_specs=[batch_spec((N, 3)),
                  full_spec((3, H1)), full_spec((1, H1)),
                  full_spec((H1, H2)), full_spec((1, H2)),
                  full_spec((H2, G)), full_spec((1, G)),
                  full_spec((G, HC + HK + HF)), full_spec((1, HC + HK + HF)),
                  full_spec((HC + HK, HEADS)), full_spec((1, HEADS))],
        out_specs=(batch_spec((1, HEADS)), batch_spec((1, HF))),
        compiler_params=_PPARAMS,
    )(pc, prep["e_w1"], prep["e_b1"], prep["e_w2"], prep["e_b2"],
      prep["e_w3"], prep["e_b3"], prep["W_h1"], prep["b_h1"],
      prep["W_h2"], prep["b_h2"])

    # wrapper-side layout plumbing on the lane-dense head slab (free XLA slices/reshape)
    coarse = heads[:, 0, :NUM_COARSE * 3].reshape(bsz, NUM_COARSE, 3)
    pred = heads[:, 0, NUM_COARSE * 3:]                                   # (B, NUM_CLASSES)

    # stage 2: folding decoder -> fine point cloud  (one launch, grid=(B,))
    fine = pl.pallas_call(
        fine_kernel,
        out_shape=jax.ShapeDtypeStruct((bsz, NUM_FINE, 3), jnp.float32),
        grid=(bsz,),
        in_specs=[batch_spec((NUM_COARSE, 3)),
                  batch_spec((1, HF)),
                  full_spec((NUM_FINE, HF)),
                  full_spec((NUM_FINE, NUM_COARSE)),
                  full_spec((3, HF)),
                  full_spec((HF, HF)), full_spec((1, HF)),
                  full_spec((HF, 3)), full_spec((1, 3))],
        out_specs=batch_spec((NUM_FINE, 3)),
        compiler_params=_PPARAMS,
    )(coarse, gh, prep["fold_const"], prep["rep"],
      prep["f_wp"], prep["f_w2"], prep["f_b2"], prep["f_w3"], prep["f_b3"])

    return coarse, fine, pred
    # TODO(synk): at production PCN sizes, cast activations/weights to bfloat16 for the MXU
    # (keep f32 accumulation) and pad the 32/64-wide lane dims up to 128.


# ---- pure-JAX reference (same math, raw un-packed params) ----------------------
def trans_forward_ref(pc, p, grid2, rep):
    relu = lambda v: jnp.maximum(v, 0.0)
    h = relu(pc @ p["e_w1"] + p["e_b1"])
    h = relu(h @ p["e_w2"] + p["e_b2"])
    h = h @ p["e_w3"] + p["e_b3"]
    g = jnp.max(h, axis=1)                                                # (B, G)
    hc = relu(g @ p["c_w1"] + p["c_b1"])
    coarse = (hc @ p["c_w2"] + p["c_b2"]).reshape(-1, NUM_COARSE, 3)
    pt = jnp.einsum("fc,bcd->bfd", rep, coarse)                           # (B, NUM_FINE, 3)
    gh = g @ p["f_wgl"]
    hf = relu(grid2 @ p["f_wg"] + pt @ p["f_wp"] + gh[:, None, :] + p["f_b1"])
    hf = relu(hf @ p["f_w2"] + p["f_b2"])
    fine = hf @ p["f_w3"] + p["f_b3"] + pt
    pred = relu(g @ p["k_w1"] + p["k_b1"]) @ p["k_w2"] + p["k_b2"]
    return coarse, fine, pred


# ---- deterministic parameter init ---------------------------------------------
def init_params(key):
    shapes_w = {
        "e_w1": (3, H1), "e_w2": (H1, H2), "e_w3": (H2, G),
        "c_w1": (G, HC), "c_w2": (HC, NUM_COARSE * 3),
        "f_wg": (2, HF), "f_wp": (3, HF), "f_wgl": (G, HF),
        "f_w2": (HF, HF), "f_w3": (HF, 3),
        "k_w1": (G, HK), "k_w2": (HK, NUM_CLASSES),
    }
    shapes_b = {
        "e_b1": (1, H1), "e_b2": (1, H2), "e_b3": (1, G),
        "c_b1": (1, HC), "c_b2": (1, NUM_COARSE * 3),
        "f_b1": (1, HF), "f_b2": (1, HF), "f_b3": (1, 3),
        "k_b1": (1, HK), "k_b2": (1, NUM_CLASSES),
    }
    params = {}
    keys = jax.random.split(key, len(shapes_w))
    for k, (name, shp) in zip(keys, sorted(shapes_w.items())):
        fan_in = shp[0]
        params[name] = (jax.random.normal(k, shp, jnp.float32) / jnp.sqrt(float(fan_in)))
    for name, shp in shapes_b.items():
        params[name] = jnp.zeros(shp, jnp.float32)
    return params


if __name__ == "__main__":
    key = jax.random.PRNGKey(0)
    kp, kx = jax.random.split(key)
    params = init_params(kp)
    pc = jax.random.normal(kx, (B, N, 3), jnp.float32)
    grid2, rep = make_fold_constants()
    prep = prepare_params(params, grid2, rep)

    fwd = jax.jit(trans_forward)
    coarse, fine, pred = fwd(pc, prep)
    jax.block_until_ready((coarse, fine, pred))

    assert coarse.shape == (B, NUM_COARSE, 3)
    assert fine.shape == (B, NUM_FINE, 3)
    assert pred.shape == (B, NUM_CLASSES)

    c_ref, f_ref, p_ref = trans_forward_ref(pc, params, grid2, rep)
    np.testing.assert_allclose(np.asarray(coarse), np.asarray(c_ref), rtol=1e-2, atol=1e-2)
    np.testing.assert_allclose(np.asarray(fine), np.asarray(f_ref), rtol=1e-2, atol=1e-2)
    np.testing.assert_allclose(np.asarray(pred), np.asarray(p_ref), rtol=1e-2, atol=1e-2)

    # TODO(synk): training-only pieces (Adam/StepLR, ChamferDistance, CrossEntropy backward)
    # are not part of forward() and are intentionally not implemented.
    print("KERNEL_OK")
</pallas_src>

<mosaic_0001>
module attributes {stable_mosaic.version = 11 : i64} {
  func.func @head_kernel(%arg0: i32, %arg1: memref<1x64x3xf32, #tpu.memory_space<vmem>>, %arg2: memref<3x64xf32, #tpu.memory_space<vmem>>, %arg3: memref<1x64xf32, #tpu.memory_space<vmem>>, %arg4: memref<64x128xf32, #tpu.memory_space<vmem>>, %arg5: memref<1x128xf32, #tpu.memory_space<vmem>>, %arg6: memref<128x32xf32, #tpu.memory_space<vmem>>, %arg7: memref<1x32xf32, #tpu.memory_space<vmem>>, %arg8: memref<32x192xf32, #tpu.memory_space<vmem>>, %arg9: memref<1x192xf32, #tpu.memory_space<vmem>>, %arg10: memref<128x56xf32, #tpu.memory_space<vmem>>, %arg11: memref<1x56xf32, #tpu.memory_space<vmem>>, %arg12: memref<1x1x56xf32, #tpu.memory_space<vmem>>, %arg13: memref<1x1x64xf32, #tpu.memory_space<vmem>>) attributes {dimension_semantics = [#tpu.dimension_semantics<parallel>], iteration_bounds = array<i64: 2>, scalar_prefetch = 0 : i64, scratch_operands = 0 : i64, tpu.core_type = #tpu.core_type<tc>, window_params = [{transform_indices = @transform_0, window_bounds = array<i64: 1, 64, 3>}, {pipeline_mode = #tpu.pipeline_mode<synchronous>, transform_indices = @transform_1, window_bounds = array<i64: 3, 64>}, {pipeline_mode = #tpu.pipeline_mode<synchronous>, transform_indices = @transform_2, window_bounds = array<i64: 1, 64>}, {pipeline_mode = #tpu.pipeline_mode<synchronous>, transform_indices = @transform_3, window_bounds = array<i64: 64, 128>}, {pipeline_mode = #tpu.pipeline_mode<synchronous>, transform_indices = @transform_4, window_bounds = array<i64: 1, 128>}, {pipeline_mode = #tpu.pipeline_mode<synchronous>, transform_indices = @transform_5, window_bounds = array<i64: 128, 32>}, {pipeline_mode = #tpu.pipeline_mode<synchronous>, transform_indices = @transform_6, window_bounds = array<i64: 1, 32>}, {pipeline_mode = #tpu.pipeline_mode<synchronous>, transform_indices = @transform_7, window_bounds = array<i64: 32, 192>}, {pipeline_mode = #tpu.pipeline_mode<synchronous>, transform_indices = @transform_8, window_bounds = array<i64: 1, 192>}, {pipeline_mode = #tpu.pipeline_mode<synchronous>, transform_indices = @transform_9, window_bounds = array<i64: 128, 56>}, {pipeline_mode = #tpu.pipeline_mode<synchronous>, transform_indices = @transform_10, window_bounds = array<i64: 1, 56>}, {transform_indices = @transform_11, window_bounds = array<i64: 1, 1, 56>}, {transform_indices = @transform_12, window_bounds = array<i64: 1, 1, 64>}]} {
    %c0 = arith.constant 0 : index
    %c0_0 = arith.constant 0 : index
    %c0_1 = arith.constant 0 : index
    %0 = vector.load %arg1[%c0, %c0_0, %c0_1] : memref<1x64x3xf32, #tpu.memory_space<vmem>>, vector<1x64x3xf32>
    %1 = vector.shape_cast %0 : vector<1x64x3xf32> to vector<64x3xf32>
    %c0_2 = arith.constant 0 : index
    %c0_3 = arith.constant 0 : index
    %2 = vector.load %arg2[%c0_2, %c0_3] : memref<3x64xf32, #tpu.memory_space<vmem>>, vector<3x64xf32>
    %cst = arith.constant dense<0.000000e+00> : vector<64x64xf32>
    %3 = tpu.matmul %1, %2, %cst {dimension_numbers = #tpu.dot_dimension_numbers<[1], [0], [0], [1], [0, 0, 1, 1], [], []>} : vector<64x3xf32>, vector<3x64xf32>, vector<64x64xf32> -> vector<64x64xf32>
    %c0_4 = arith.constant 0 : index
    %c0_5 = arith.constant 0 : index
    %4 = vector.load %arg3[%c0_4, %c0_5] : memref<1x64xf32, #tpu.memory_space<vmem>>, vector<1x64xf32>
    %5 = vector.broadcast %4 : vector<1x64xf32> to vector<64x64xf32>
    %6 = arith.addf %3, %5 : vector<64x64xf32>
    %cst_6 = arith.constant 0.000000e+00 : f32
    %7 = vector.broadcast %cst_6 : f32 to vector<64x64xf32>
    %8 = arith.maximumf %6, %7 : vector<64x64xf32>
    %c0_7 = arith.constant 0 : index
    %c0_8 = arith.constant 0 : index
    %9 = vector.load %arg4[%c0_7, %c0_8] : memref<64x128xf32, #tpu.memory_space<vmem>>, vector<64x128xf32>
    %cst_9 = arith.constant dense<0.000000e+00> : vector<64x128xf32>
    %10 = tpu.matmul %8, %9, %cst_9 {dimension_numbers = #tpu.dot_dimension_numbers<[1], [0], [0], [1], [0, 0, 1, 1], [], []>} : vector<64x64xf32>, vector<64x128xf32>, vector<64x128xf32> -> vector<64x128xf32>
    %c0_10 = arith.constant 0 : index
    %c0_11 = arith.constant 0 : index
    %11 = vector.load %arg5[%c0_10, %c0_11] : memref<1x128xf32, #tpu.memory_space<vmem>>, vector<1x128xf32>
    %12 = vector.broadcast %11 : vector<1x128xf32> to vector<64x128xf32>
    %13 = arith.addf %10, %12 : vector<64x128xf32>
    %cst_12 = arith.constant 0.000000e+00 : f32
    %14 = vector.broadcast %cst_12 : f32 to vector<64x128xf32>
    %15 = arith.maximumf %13, %14 : vector<64x128xf32>
    %c0_13 = arith.constant 0 : index
    %c0_14 = arith.constant 0 : index
    %16 = vector.load %arg6[%c0_13, %c0_14] : memref<128x32xf32, #tpu.memory_space<vmem>>, vector<128x32xf32>
    %cst_15 = arith.constant dense<0.000000e+00> : vector<64x32xf32>
    %17 = tpu.matmul %15, %16, %cst_15 {dimension_numbers = #tpu.dot_dimension_numbers<[1], [0], [0], [1], [0, 0, 1, 1], [], []>} : vector<64x128xf32>, vector<128x32xf32>, vector<64x32xf32> -> vector<64x32xf32>
    %c0_16 = arith.constant 0 : index
    %c0_17 = arith.constant 0 : index
    %18 = vector.load %arg7[%c0_16, %c0_17] : memref<1x32xf32, #tpu.memory_space<vmem>>, vector<1x32xf32>
    %19 = vector.broadcast %18 : vector<1x32xf32> to vector<64x32xf32>
    %20 = arith.addf %17, %19 : vector<64x32xf32>
    %cst_18 = arith.constant dense<0xFF800000> : vector<32xf32>
    %21 = vector.multi_reduction <maximumf>, %20, %cst_18 [0] : vector<64x32xf32> to vector<32xf32>
    %22 = vector.shape_cast %21 : vector<32xf32> to vector<1x32xf32>
    %c0_19 = arith.constant 0 : index
    %c0_20 = arith.constant 0 : index
    %23 = vector.load %arg8[%c0_19, %c0_20] : memref<32x192xf32, #tpu.memory_space<vmem>>, vector<32x192xf32>
    %cst_21 = arith.constant dense<0.000000e+00> : vector<1x192xf32>
    %24 = tpu.matmul %22, %23, %cst_21 {dimension_numbers = #tpu.dot_dimension_numbers<[1], [0], [0], [1], [0, 0, 1, 1], [], []>} : vector<1x32xf32>, vector<32x192xf32>, vector<1x192xf32> -> vector<1x192xf32>
    %c0_22 = arith.constant 0 : index
    %c0_23 = arith.constant 0 : index
    %25 = vector.load %arg9[%c0_22, %c0_23] : memref<1x192xf32, #tpu.memory_space<vmem>>, vector<1x192xf32>
    %26 = arith.addf %24, %25 : vector<1x192xf32>
    %27 = vector.extract_strided_slice %26 {offsets = [0, 0], sizes = [1, 128], strides = [1, 1]} : vector<1x192xf32> to vector<1x128xf32>
    %cst_24 = arith.constant 0.000000e+00 : f32
    %28 = vector.broadcast %cst_24 : f32 to vector<1x128xf32>
    %29 = arith.maximumf %27, %28 : vector<1x128xf32>
    %30 = vector.extract_strided_slice %26 {offsets = [0, 128], sizes = [1, 64], strides = [1, 1]} : vector<1x192xf32> to vector<1x64xf32>
    %c0_25 = arith.constant 0 : index
    %c0_26 = arith.constant 0 : index
    %c0_27 = arith.constant 0 : index
    %31 = vector.load %arg13[%c0_25, %c0_26, %c0_27] : memref<1x1x64xf32, #tpu.memory_space<vmem>>, vector<1x1x64xf32>
    %32 = vector.shape_cast %31 : vector<1x1x64xf32> to vector<1x64xf32>
    %33 = vector.shape_cast %30 : vector<1x64xf32> to vector<1x1x64xf32>
    tpu.vector_store %arg13[%c0_25, %c0_26, %c0_27], %33 {strides = array<i32>} : memref<1x1x64xf32, #tpu.memory_space<vmem>>, vector<1x1x64xf32>,
    %c0_28 = arith.constant 0 : index
    %c0_29 = arith.constant 0 : index
    %34 = vector.load %arg10[%c0_28, %c0_29] : memref<128x56xf32, #tpu.memory_space<vmem>>, vector<128x56xf32>
    %cst_30 = arith.constant dense<0.000000e+00> : vector<1x56xf32>
    %35 = tpu.matmul %29, %34, %cst_30 {dimension_numbers = #tpu.dot_dimension_numbers<[1], [0], [0], [1], [0, 0, 1, 1], [], []>} : vector<1x128xf32>, vector<128x56xf32>, vector<1x56xf32> -> vector<1x56xf32>
    %c0_31 = arith.constant 0 : index
    %c0_32 = arith.constant 0 : index
    %36 = vector.load %arg11[%c0_31, %c0_32] : memref<1x56xf32, #tpu.memory_space<vmem>>, vector<1x56xf32>
    %37 = arith.addf %35, %36 : vector<1x56xf32>
    %c0_33 = arith.constant 0 : index
    %c0_34 = arith.constant 0 : index
    %c0_35 = arith.constant 0 : index
    %38 = vector.load %arg12[%c0_33, %c0_34, %c0_35] : memref<1x1x56xf32, #tpu.memory_space<vmem>>, vector<1x1x56xf32>
    %39 = vector.shape_cast %38 : vector<1x1x56xf32> to vector<1x56xf32>
    %40 = vector.shape_cast %37 : vector<1x56xf32> to vector<1x1x56xf32>
    tpu.vector_store %arg12[%c0_33, %c0_34, %c0_35], %40 {strides = array<i32>} : memref<1x1x56xf32, #tpu.memory_space<vmem>>, vector<1x1x56xf32>,
    return
  }
  func.func @transform_0(%arg0: i32) -> (i32, i32, i32) {
    %c0_i32 = arith.constant 0 : i32
    %c0_i32_0 = arith.constant 0 : i32
    %c0_i32_1 = arith.constant 0 : i32
    return %arg0, %c0_i32, %c0_i32_0 : i32, i32, i32
  }
  func.func @transform_1(%arg0: i32) -> (i32, i32) {
    %c0_i32 = arith.constant 0 : i32
    %c0_i32_0 = arith.constant 0 : i32
    %c0_i32_1 = arith.constant 0 : i32
    return %c0_i32, %c0_i32_0 : i32, i32
  }
  func.func @transform_2(%arg0: i32) -> (i32, i32) {
    %c0_i32 = arith.constant 0 : i32
    %c0_i32_0 = arith.constant 0 : i32
    %c0_i32_1 = arith.constant 0 : i32
    return %c0_i32, %c0_i32_0 : i32, i32
  }
  func.func @transform_3(%arg0: i32) -> (i32, i32) {
    %c0_i32 = arith.constant 0 : i32
    %c0_i32_0 = arith.constant 0 : i32
    %c0_i32_1 = arith.constant 0 : i32
    return %c0_i32, %c0_i32_0 : i32, i32
  }
  func.func @transform_4(%arg0: i32) -> (i32, i32) {
    %c0_i32 = arith.constant 0 : i32
    %c0_i32_0 = arith.constant 0 : i32
    %c0_i32_1 = arith.constant 0 : i32
    return %c0_i32, %c0_i32_0 : i32, i32
  }
  func.func @transform_5(%arg0: i32) -> (i32, i32) {
    %c0_i32 = arith.constant 0 : i32
    %c0_i32_0 = arith.constant 0 : i32
    %c0_i32_1 = arith.constant 0 : i32
    return %c0_i32, %c0_i32_0 : i32, i32
  }
  func.func @transform_6(%arg0: i32) -> (i32, i32) {
    %c0_i32 = arith.constant 0 : i32
    %c0_i32_0 = arith.constant 0 : i32
    %c0_i32_1 = arith.constant 0 : i32
    return %c0_i32, %c0_i32_0 : i32, i32
  }
  func.func @transform_7(%arg0: i32) -> (i32, i32) {
    %c0_i32 = arith.constant 0 : i32
    %c0_i32_0 = arith.constant 0 : i32
    %c0_i32_1 = arith.constant 0 : i32
    return %c0_i32, %c0_i32_0 : i32, i32
  }
  func.func @transform_8(%arg0: i32) -> (i32, i32) {
    %c0_i32 = arith.constant 0 : i32
    %c0_i32_0 = arith.constant 0 : i32
    %c0_i32_1 = arith.constant 0 : i32
    return %c0_i32, %c0_i32_0 : i32, i32
  }
  func.func @transform_9(%arg0: i32) -> (i32, i32) {
    %c0_i32 = arith.constant 0 : i32
    %c0_i32_0 = arith.constant 0 : i32
    %c0_i32_1 = arith.constant 0 : i32
    return %c0_i32, %c0_i32_0 : i32, i32
  }
  func.func @transform_10(%arg0: i32) -> (i32, i32) {
    %c0_i32 = arith.constant 0 : i32
    %c0_i32_0 = arith.constant 0 : i32
    %c0_i32_1 = arith.constant 0 : i32
    return %c0_i32, %c0_i32_0 : i32, i32
  }
  func.func @transform_11(%arg0: i32) -> (i32, i32, i32) {
    %c0_i32 = arith.constant 0 : i32
    %c0_i32_0 = arith.constant 0 : i32
    %c0_i32_1 = arith.constant 0 : i32
    return %arg0, %c0_i32, %c0_i32_0 : i32, i32, i32
  }
  func.func @transform_12(%arg0: i32) -> (i32, i32, i32) {
    %c0_i32 = arith.constant 0 : i32
    %c0_i32_0 = arith.constant 0 : i32
    %c0_i32_1 = arith.constant 0 : i32
    return %arg0, %c0_i32, %c0_i32_0 : i32, i32, i32
  }
}

module attributes {stable_mosaic.version = 11 : i64} {
  func.func @fine_kernel(%arg0: i32, %arg1: memref<1x16x3xf32, #tpu.memory_space<vmem>>, %arg2: memref<1x1x64xf32, #tpu.memory_space<vmem>>, %arg3: memref<64x64xf32, #tpu.memory_space<vmem>>, %arg4: memref<64x16xf32, #tpu.memory_space<vmem>>, %arg5: memref<3x64xf32, #tpu.memory_space<vmem>>, %arg6: memref<64x64xf32, #tpu.memory_space<vmem>>, %arg7: memref<1x64xf32, #tpu.memory_space<vmem>>, %arg8: memref<64x3xf32, #tpu.memory_space<vmem>>, %arg9: memref<1x3xf32, #tpu.memory_space<vmem>>, %arg10: memref<1x64x3xf32, #tpu.memory_space<vmem>>) attributes {dimension_semantics = [#tpu.dimension_semantics<parallel>], iteration_bounds = array<i64: 2>, scalar_prefetch = 0 : i64, scratch_operands = 0 : i64, tpu.core_type = #tpu.core_type<tc>, window_params = [{transform_indices = @transform_0, window_bounds = array<i64: 1, 16, 3>}, {transform_indices = @transform_1, window_bounds = array<i64: 1, 1, 64>}, {pipeline_mode = #tpu.pipeline_mode<synchronous>, transform_indices = @transform_2, window_bounds = array<i64: 64, 64>}, {pipeline_mode = #tpu.pipeline_mode<synchronous>, transform_indices = @transform_3, window_bounds = array<i64: 64, 16>}, {pipeline_mode = #tpu.pipeline_mode<synchronous>, transform_indices = @transform_4, window_bounds = array<i64: 3, 64>}, {pipeline_mode = #tpu.pipeline_mode<synchronous>, transform_indices = @transform_5, window_bounds = array<i64: 64, 64>}, {pipeline_mode = #tpu.pipeline_mode<synchronous>, transform_indices = @transform_6, window_bounds = array<i64: 1, 64>}, {pipeline_mode = #tpu.pipeline_mode<synchronous>, transform_indices = @transform_7, window_bounds = array<i64: 64, 3>}, {pipeline_mode = #tpu.pipeline_mode<synchronous>, transform_indices = @transform_8, window_bounds = array<i64: 1, 3>}, {transform_indices = @transform_9, window_bounds = array<i64: 1, 64, 3>}]} {
    %c0 = arith.constant 0 : index
    %c0_0 = arith.constant 0 : index
    %c0_1 = arith.constant 0 : index
    %0 = vector.load %arg1[%c0, %c0_0, %c0_1] : memref<1x16x3xf32, #tpu.memory_space<vmem>>, vector<1x16x3xf32>
    %1 = vector.shape_cast %0 : vector<1x16x3xf32> to vector<16x3xf32>
    %c0_2 = arith.constant 0 : index
    %c0_3 = arith.constant 0 : index
    %2 = vector.load %arg4[%c0_2, %c0_3] : memref<64x16xf32, #tpu.memory_space<vmem>>, vector<64x16xf32>
    %cst = arith.constant dense<0.000000e+00> : vector<64x3xf32>
    %3 = tpu.matmul %2, %1, %cst {dimension_numbers = #tpu.dot_dimension_numbers<[1], [0], [0], [1], [0, 0, 1, 1], [], []>} : vector<64x16xf32>, vector<16x3xf32>, vector<64x3xf32> -> vector<64x3xf32>
    %c0_4 = arith.constant 0 : index
    %c0_5 = arith.constant 0 : index
    %4 = vector.load %arg3[%c0_4, %c0_5] : memref<64x64xf32, #tpu.memory_space<vmem>>, vector<64x64xf32>
    %c0_6 = arith.constant 0 : index
    %c0_7 = arith.constant 0 : index
    %5 = vector.load %arg5[%c0_6, %c0_7] : memref<3x64xf32, #tpu.memory_space<vmem>>, vector<3x64xf32>
    %cst_8 = arith.constant dense<0.000000e+00> : vector<64x64xf32>
    %6 = tpu.matmul %3, %5, %cst_8 {dimension_numbers = #tpu.dot_dimension_numbers<[1], [0], [0], [1], [0, 0, 1, 1], [], []>} : vector<64x3xf32>, vector<3x64xf32>, vector<64x64xf32> -> vector<64x64xf32>
    %7 = arith.addf %4, %6 : vector<64x64xf32>
    %c0_9 = arith.constant 0 : index
    %c0_10 = arith.constant 0 : index
    %c0_11 = arith.constant 0 : index
    %8 = vector.load %arg2[%c0_9, %c0_10, %c0_11] : memref<1x1x64xf32, #tpu.memory_space<vmem>>, vector<1x1x64xf32>
    %9 = vector.shape_cast %8 : vector<1x1x64xf32> to vector<1x64xf32>
    %10 = vector.broadcast %9 : vector<1x64xf32> to vector<64x64xf32>
    %11 = arith.addf %7, %10 : vector<64x64xf32>
    %cst_12 = arith.constant 0.000000e+00 : f32
    %12 = vector.broadcast %cst_12 : f32 to vector<64x64xf32>
    %13 = arith.maximumf %11, %12 : vector<64x64xf32>
    %c0_13 = arith.constant 0 : index
    %c0_14 = arith.constant 0 : index
    %14 = vector.load %arg6[%c0_13, %c0_14] : memref<64x64xf32, #tpu.memory_space<vmem>>, vector<64x64xf32>
    %cst_15 = arith.constant dense<0.000000e+00> : vector<64x64xf32>
    %15 = tpu.matmul %13, %14, %cst_15 {dimension_numbers = #tpu.dot_dimension_numbers<[1], [0], [0], [1], [0, 0, 1, 1], [], []>} : vector<64x64xf32>, vector<64x64xf32>, vector<64x64xf32> -> vector<64x64xf32>
    %c0_16 = arith.constant 0 : index
    %c0_17 = arith.constant 0 : index
    %16 = vector.load %arg7[%c0_16, %c0_17] : memref<1x64xf32, #tpu.memory_space<vmem>>, vector<1x64xf32>
    %17 = vector.broadcast %16 : vector<1x64xf32> to vector<64x64xf32>
    %18 = arith.addf %15, %17 : vector<64x64xf32>
    %cst_18 = arith.constant 0.000000e+00 : f32
    %19 = vector.broadcast %cst_18 : f32 to vector<64x64xf32>
    %20 = arith.maximumf %18, %19 : vector<64x64xf32>
    %c0_19 = arith.constant 0 : index
    %c0_20 = arith.constant 0 : index
    %21 = vector.load %arg8[%c0_19, %c0_20] : memref<64x3xf32, #tpu.memory_space<vmem>>, vector<64x3xf32>
    %cst_21 = arith.constant dense<0.000000e+00> : vector<64x3xf32>
    %22 = tpu.matmul %20, %21, %cst_21 {dimension_numbers = #tpu.dot_dimension_numbers<[1], [0], [0], [1], [0, 0, 1, 1], [], []>} : vector<64x64xf32>, vector<64x3xf32>, vector<64x3xf32> -> vector<64x3xf32>
    %c0_22 = arith.constant 0 : index
    %c0_23 = arith.constant 0 : index
    %23 = vector.load %arg9[%c0_22, %c0_23] : memref<1x3xf32, #tpu.memory_space<vmem>>, vector<1x3xf32>
    %24 = vector.broadcast %23 : vector<1x3xf32> to vector<64x3xf32>
    %25 = arith.addf %22, %24 : vector<64x3xf32>
    %26 = arith.addf %25, %3 : vector<64x3xf32>
    %c0_24 = arith.constant 0 : index
    %c0_25 = arith.constant 0 : index
    %c0_26 = arith.constant 0 : index
    %27 = vector.load %arg10[%c0_24, %c0_25, %c0_26] : memref<1x64x3xf32, #tpu.memory_space<vmem>>, vector<1x64x3xf32>
    %28 = vector.shape_cast %27 : vector<1x64x3xf32> to vector<64x3xf32>
    %29 = vector.shape_cast %26 : vector<64x3xf32> to vector<1x64x3xf32>
    tpu.vector_store %arg10[%c0_24, %c0_25, %c0_26], %29 {strides = array<i32>} : memref<1x64x3xf32, #tpu.memory_space<vmem>>, vector<1x64x3xf32>,
    return
  }
  func.func @transform_0(%arg0: i32) -> (i32, i32, i32) {
    %c0_i32 = arith.constant 0 : i32
    %c0_i32_0 = arith.constant 0 : i32
    %c0_i32_1 = arith.constant 0 : i32
    return %arg0, %c0_i32, %c0_i32_0 : i32, i32, i32
  }
  func.func @transform_1(%arg0: i32) -> (i32, i32, i32) {
    %c0_i32 = arith.constant 0 : i32
    %c0_i32_0 = arith.constant 0 : i32
    %c0_i32_1 = arith.constant 0 : i32
    return %arg0, %c0_i32, %c0_i32_0 : i32, i32, i32
  }
  func.func @transform_2(%arg0: i32) -> (i32, i32) {
    %c0_i32 = arith.constant 0 : i32
    %c0_i32_0 = arith.constant 0 : i32
    %c0_i32_1 = arith.constant 0 : i32
    return %c0_i32, %c0_i32_0 : i32, i32
  }
  func.func @transform_3(%arg0: i32) -> (i32, i32) {
    %c0_i32 = arith.constant 0 : i32
    %c0_i32_0 = arith.constant 0 : i32
    %c0_i32_1 = arith.constant 0 : i32
    return %c0_i32, %c0_i32_0 : i32, i32
  }
  func.func @transform_4(%arg0: i32) -> (i32, i32) {
    %c0_i32 = arith.constant 0 : i32
    %c0_i32_0 = arith.constant 0 : i32
    %c0_i32_1 = arith.constant 0 : i32
    return %c0_i32, %c0_i32_0 : i32, i32
  }
  func.func @transform_5(%arg0: i32) -> (i32, i32) {
    %c0_i32 = arith.constant 0 : i32
    %c0_i32_0 = arith.constant 0 : i32
    %c0_i32_1 = arith.constant 0 : i32
    return %c0_i32, %c0_i32_0 : i32, i32
  }
  func.func @transform_6(%arg0: i32) -> (i32, i32) {
    %c0_i32 = arith.constant 0 : i32
    %c0_i32_0 = arith.constant 0 : i32
    %c0_i32_1 = arith.constant 0 : i32
    return %c0_i32, %c0_i32_0 : i32, i32
  }
  func.func @transform_7(%arg0: i32) -> (i32, i32) {
    %c0_i32 = arith.constant 0 : i32
    %c0_i32_0 = arith.constant 0 : i32
    %c0_i32_1 = arith.constant 0 : i32
    return %c0_i32, %c0_i32_0 : i32, i32
  }
  func.func @transform_8(%arg0: i32) -> (i32, i32) {
    %c0_i32 = arith.constant 0 : i32
    %c0_i32_0 = arith.constant 0 : i32
    %c0_i32_1 = arith.constant 0 : i32
    return %c0_i32, %c0_i32_0 : i32, i32
  }
  func.func @transform_9(%arg0: i32) -> (i32, i32, i32) {
    %c0_i32 = arith.constant 0 : i32
    %c0_i32_0 = arith.constant 0 : i32
    %c0_i32_1 = arith.constant 0 : i32
    return %arg0, %c0_i32, %c0_i32_0 : i32, i32, i32
  }
}

</mosaic_0001>

<bundles_post_ra>
// kernel: squeeze.2
= control target key start
LH: loop header
LB: loop body
LE: loop exit
PB: predicated region body
PF: predicated region fallthrough
CT: control target
= control target key end

     0   :  { %s130_s8 = smov 125   ;;  %s131_s9 = smov 113   ;;  %vm7_vm0 = vcmask 23552   ;;  %s221_s0 = inlined_call_operand.vmem [shape: f32[2,48], index: 0, kind: input, shape index: {}]   ;;  %s222_s1 = inlined_call_operand.vmem [shape: f32[2,16,3], index: 1, kind: output, shape index: {}]  }
   0x1   :  { %v4_v0 = vld [vmem:[%s221_s0] sm:$0x3]  ;;  %s129_s0 = smov 119   ;;  %s132_s10 = smov 116  }
   0x2   :  { %5 = vst [vmem:[#allocation0] sm:$0x3] %v4_v0  ;;  %s133_s11 = smov 122   ;;  %s134_s12 = smov 110  }
   0x3   :  { %s135_s13 = smov 104   ;;  %s136_s14 = smov 107  }
   0x4   :  { %s137_s15 = smov 101   ;;  %s138_s16 = smov 95  }
   0x5   :  { %s139_s17 = smov 98   ;;  %s140_s18 = smov 92  }
   0x6   :  { %s141_s19 = smov 86   ;;  %s142_s20 = smov 89  }
   0x7   :  { %s143_s21 = smov 83  }
   0x9   :  { %v21_v1 = vld [vmem:[#allocation0] sm:$0x3]  }
   0xa   :  { %v9_v2 = vld [vmem:[#allocation0] sm:$0x3]   ;;  %22 = vrot.lane.b32.xlu1 %v21_v1, %s129_s0 }
   0xb   :  { %10 = vrot.lane.b32.xlu0 %v9_v2, %s130_s8  ;;  %v33_v3 = vld [vmem:[#allocation0] sm:$0x3]  }
   0xc   :  { %34 = vrot.lane.b32.xlu2 %v33_v3, %s131_s9  ;;  %v27_v4 = vld [vmem:[#allocation0] sm:$0x3]  }
   0xd   :  { %v15_v5 = vld [vmem:[#allocation0] sm:$0x3]  }
   0xe   :  { %v39_v6 = vld [vmem:[#allocation0] sm:$0x3]  }
   0xf   :  { %v51_v7 = vld [vmem:[#allocation0] sm:$0x3]  }
  0x10   :  { %v45_v8 = vld [vmem:[#allocation0] sm:$0x3]  }
  0x11   :  { %v57_v9 = vld [vmem:[#allocation0] sm:$0x3]  }
  0x12   :  { %28 = vrot.lane.b32.xlu1 %v27_v4, %s132_s10  ;;  %v69_v10 = vld [vmem:[#allocation0] sm:$0x3]  }
  0x13   :  { %16 = vrot.lane.b32.xlu0 %v15_v5, %s133_s11  ;;  %v63_v11 = vld [vmem:[#allocation0] sm:$0x3]  }
  0x14   :  { %40 = vrot.lane.b32.xlu2 %v39_v6, %s134_s12  ;;  %v75_v12 = vld [vmem:[#allocation0] sm:$0x3]  }
  0x15   :  { %v87_v13 = vld [vmem:[#allocation0] sm:$0x3]  }
  0x16   :  { %v81_v14 = vld [vmem:[#allocation0] sm:$0x3]  }
  0x17   :  { %v93_v15 = vld [vmem:[#allocation0] sm:$0x3]  }
  0x18   :  { %v6_v21 = vld [vmem:[#allocation0] sm:$0x3]  }
  0x19   :  { %8 = vst.msk [vmem:[%s222_s1] ss:$16 sm:$0x3] %vm7_vm0, %v6_v21  }
  0x1a   :  { %52 = vrot.lane.b32.xlu1 %v51_v7, %s135_s13 }
  0x1b   :  { %46 = vrot.lane.b32.xlu0 %v45_v8, %s136_s14 }
  0x1c   :  { %58 = vrot.lane.b32.xlu2 %v57_v9, %s137_s15 }
  0x22   :  { %70 = vrot.lane.b32.xlu1 %v69_v10, %s138_s16 }
  0x23   :  { %64 = vrot.lane.b32.xlu0 %v63_v11, %s139_s17 }
  0x24   :  { %76 = vrot.lane.b32.xlu2 %v75_v12, %s140_s18 }
  0x2a   :  { %88 = vrot.lane.b32.xlu1 %v87_v13, %s141_s19 }
  0x2b   :  { %82 = vrot.lane.b32.xlu0 %v81_v14, %s142_s20 }
  0x2c   :  { %94 = vrot.lane.b32.xlu2 %v93_v15, %s143_s21 }
  0x66   :  { %v35_v16 = vpop.permute.xlu2 %34  }
  0x67   :  { %103 = vst.msk [vmem:[%s222_s1 + $0x5] ss:$16 sm:$0x3] %vm7_vm0, %v35_v16  }
  0x6e   :  { %v41_v17 = vpop.permute.xlu2 %40  }
  0x6f   :  { %104 = vst.msk [vmem:[%s222_s1 + $0x6] ss:$16 sm:$0x3] %vm7_vm0, %v41_v17  }
  0x76   :  { %v59_v18 = vpop.permute.xlu2 %58  }
  0x77   :  { %107 = vst.msk [vmem:[%s222_s1 + $0x9] ss:$16 sm:$0x3] %vm7_vm0, %v59_v18  }
  0x7c   :  { %v23_v19 = vpop.permute.xlu1 %22  }
  0x7d   :  { %v11_v20 = vpop.permute.xlu0 %10   ;;  %101 = vst.msk [vmem:[%s222_s1 + $0x3] ss:$16 sm:$0x3] %vm7_vm0, %v23_v19  }
  0x7e   :  { %99 = vst.msk [vmem:[%s222_s1 + $0x1] ss:$16 sm:$0x3] %vm7_vm0, %v11_v20   ;;  %v77_v22 = vpop.permute.xlu2 %76  }
  0x7f   :  { %110 = vst.msk [vmem:[%s222_s1 + $0xc] ss:$16 sm:$0x3] %vm7_vm0, %v77_v22  }
  0x84   :  { %v29_v23 = vpop.permute.xlu1 %28  }
  0x85   :  { %v17_v24 = vpop.permute.xlu0 %16   ;;  %102 = vst.msk [vmem:[%s222_s1 + $0x4] ss:$16 sm:$0x3] %vm7_vm0, %v29_v23  }
  0x86   :  { %100 = vst.msk [vmem:[%s222_s1 + $0x2] ss:$16 sm:$0x3] %vm7_vm0, %v17_v24   ;;  %v95_v25 = vpop.permute.xlu2 %94  }
  0x87   :  { %113 = vst.msk [vmem:[%s222_s1 + $0xf] ss:$16 sm:$0x3] %vm7_vm0, %v95_v25  }
  0x8c   :  { %v53_v26 = vpop.permute.xlu1 %52  }
  0x8d   :  { %v47_v27 = vpop.permute.xlu0 %46   ;;  %106 = vst.msk [vmem:[%s222_s1 + $0x8] ss:$16 sm:$0x3] %vm7_vm0, %v53_v26  }
  0x8e   :  { %105 = vst.msk [vmem:[%s222_s1 + $0x7] ss:$16 sm:$0x3] %vm7_vm0, %v47_v27  }
  0x94   :  { %v71_v28 = vpop.permute.xlu1 %70  }
  0x95   :  { %v65_v29 = vpop.permute.xlu0 %64   ;;  %109 = vst.msk [vmem:[%s222_s1 + $0xb] ss:$16 sm:$0x3] %vm7_vm0, %v71_v28  }
  0x96   :  { %108 = vst.msk [vmem:[%s222_s1 + $0xa] ss:$16 sm:$0x3] %vm7_vm0, %v65_v29  }
  0x9c   :  { %v89_v30 = vpop.permute.xlu1 %88  }
  0x9d   :  { %v83_v31 = vpop.permute.xlu0 %82   ;;  %112 = vst.msk [vmem:[%s222_s1 + $0xe] ss:$16 sm:$0x3] %vm7_vm0, %v89_v30  }
  0x9e   :  { %111 = vst.msk [vmem:[%s222_s1 + $0xd] ss:$16 sm:$0x3] %vm7_vm0, %v83_v31  }

// kernel: trans_forward.3
= control target key start
LH: loop header
LB: loop body
LE: loop exit
PB: predicated region body
PF: predicated region fallthrough
CT: control target
= control target key end

     0   :  { %s888_s30 = smov 0   ;;  %s1095_s0 = inlined_call_operand.vmem [shape: f32[2,16,3], index: 0, kind: input, shape index: {}]   ;;  %s1096_s1 = inlined_call_operand.vmem [shape: f32[2,1,64], index: 1, kind: input, shape index: {}]   ;;  %s1097_s2 = inlined_call_operand.vmem [shape: f32[64,64], index: 2, kind: input, shape index: {}]   ;;  %s1098_s3 = inlined_call_operand.vmem [shape: f32[64,16], index: 3, kind: input, shape index: {}]   ;;  %s1099_s4 = inlined_call_operand.vmem [shape: f32[3,64], index: 4, kind: input, shape index: {}]   ;;  %s1100_s5 = inlined_call_operand.vmem [shape: f32[64,64], index: 5, kind: input, shape index: {}]   ;;  %s1101_s6 = inlined_call_operand.vmem [shape: f32[1,64], index: 6, kind: input, shape index: {}]   ;;  %s1102_s7 = inlined_call_operand.vmem [shape: f32[64,3], index: 7, kind: input, shape index: {}]   ;;  %s1103_s8 = inlined_call_operand.vmem [shape: f32[1,3], index: 8, kind: input, shape index: {}]   ;;  %s1104_s9 = inlined_call_operand.vmem [shape: f32[2,64,3], index: 9, kind: output, shape index: {}]  }
   0x1 LB: > { %s773_s10 = sadd.s32 4294967295, %s836_s30   ;;  %p777_p0 = scmp.ge.s32.totalorder %s836_s30, 1  ;;  %s836_s30 = sphi %s888_s30, %s19_s30  }
   0x2   : > { %p295_p1 = scmp.lt.s32.totalorder %s836_s30, 3 }
   0x4   : > { %p296_p2 = pnand %p777_p0, %p295_p1 }
   0x5   : > { %p334_p3 = scmp.lt.s32.totalorder (!%p296_p2), %s773_s10, 1 }
   0x6   : > { %299 = sbr.rel (%p296_p2) target bundleno = 605 (0x25d), region = 56 }
   0xb   : > { %s1106_s10 = smov (!%p334_p3, %s773_s10), 1  ;;  %v349_v2 = vld [vmem:[%s1098_s3] sm:$0xff]  ;;  %vm357_vm0 = vcmask 130048   ;;  %v350_v3 = vld [vmem:[%s1098_s3 + $0x8] sm:$0xff]  ;;  %v351_v4 = vld [vmem:[%s1098_s3 + $0x10] sm:$0xff]  ;;  %vm457_vm1 = vcmask 1042432  }
   0xc   : > { %s817_s11 = sshll.u32 %s1106_s10, 4  ;;  %s341_s14 = scalar_lea.vmem %s1096_s1, %s1106_s10  ;;  %v352_v5 = vld [vmem:[%s1098_s3 + $0x18] sm:$0xff]  ;;  %v353_v6 = vld [vmem:[%s1098_s3 + $0x20] sm:$0xff]  ;;  %v354_v7 = vld [vmem:[%s1098_s3 + $0x28] sm:$0xff]  ;;  %vm432_vm2 = vcmask 23552   ;;  %vm542_vm3 = vcmask 523264  }
   0xd   : > { %s338_s17 = scalar_lea.vmem %s1095_s0, %s817_s11  ;;  %v355_v8 = vld [vmem:[%s1098_s3 + $0x30] sm:$0xff]  ;;  %v356_v9 = vld [vmem:[%s1098_s3 + $0x38] sm:$0xff]  ;;  %v431_v10 = vld [vmem:[%s1099_s4] sm:$0x7]  ;;  %s818_s16 = sshll.u32 %s1106_s10, 6 }
   0xe   : > { %v348_v0 = vld [vmem:[%s338_s17 + $0x8] sm:$0xff]  ;;  %v347_v1 = vld [vmem:[%s338_s17] sm:$0xff]  ;;  %790 = vmatpush.msk.msra.mxu1 %vm457_vm1, %v431_v10  ;;  %v537_v15 = vld [vmem:[%s1100_s5 + $0x38] sm:$0xff]  ;;  %s346_s19 = scalar_lea.vmem %s1104_s9, %s818_s16 }
   0xf   : > { %396 = vmatpush.msra.mxu0 %v348_v0  ;;  %v536_v16 = vld [vmem:[%s1100_s5 + $0x30] sm:$0xff]  ;;  %575 = vmatpush.msra.mxu2 %v537_v15  ;;  %v535_v17 = vld [vmem:[%s1100_s5 + $0x28] sm:$0xff]  ;;  %v534_v18 = vld [vmem:[%s1100_s5 + $0x20] sm:$0xff] }
  0x10   : > { %v533_v23 = vld [vmem:[%s1100_s5 + $0x18] sm:$0xff]  ;;  %v532_v24 = vld [vmem:[%s1100_s5 + $0x10] sm:$0xff]  ;;  %v531_v25 = vld [vmem:[%s1100_s5 + $0x8] sm:$0xff] }
  0x11   : > { %397 = vmatpush.msra.mxu0 %v347_v1  ;;  %576 = vmatpush.msra.mxu2 %v536_v16  ;;  %v530_v26 = vld [vmem:[%s1100_s5] sm:$0xff]  ;;  %v424_v33 = vld [vmem:[%s1097_s2 + $0x8] sm:$0xff]  ;;  %v425_v38 = vld [vmem:[%s1097_s2 + $0x10] sm:$0xff] }
  0x12   : > { %782 = vmatmul.msk.f32.vlgmr.msra.gmra.mxu0 %vm357_vm0, %v349_v2  ;;  %v423_v27 = vld [vmem:[%s1097_s2] sm:$0xff]  ;;  %v426_v43 = vld [vmem:[%s1097_s2 + $0x18] sm:$0xff]  ;;  %v622_v50 = vld [vmem:[%s1102_s7 + $0x30] sm:$0xff] }
  0x13   : > { %577 = vmatpush.msra.mxu2 %v535_v17  ;;  %v827_v28 = vld [vmem:[%s341_s14] ss:$0 sm:$0xff]  ;;  %v623_v49 = vld [vmem:[%s1102_s7 + $0x38] sm:$0xff]  ;;  %v621_v53 = vld [vmem:[%s1102_s7 + $0x28] sm:$0xff] }
  0x14   : > { %v427_v48 = vld [vmem:[%s1097_s2 + $0x20] sm:$0xff]  ;;  %660 = vmatpush.msra.mxu3 %v623_v49  ;;  %v619_v57 = vld [vmem:[%s1102_s7 + $0x18] sm:$0xff]  ;;  %v428_v58 = vld [vmem:[%s1097_s2 + $0x28] sm:$0xff] }
  0x15   : > { %578 = vmatpush.msra.mxu2 %v534_v18  ;;  %v620_v55 = vld [vmem:[%s1102_s7 + $0x20] sm:$0xff]  ;;  %v429_v63 = vld [vmem:[%s1097_s2 + $0x30] sm:$0xff]  ;;  %v617_v10 = vld [vmem:[%s1102_s7 + $0x8] sm:$0xff] }
  0x16   : > { %661 = vmatpush.msra.mxu3 %v622_v50  ;;  %v616_v15 = vld [vmem:[%s1102_s7] sm:$0xff] }
  0x17   : > { %579 = vmatpush.msra.mxu2 %v533_v23  ;;  %v828_v16 = vld [vmem:[%s1101_s6] ss:$0 sm:$0xff] }
  0x18   : > { %662 = vmatpush.msra.mxu3 %v621_v53 }
  0x19   : > { %580 = vmatpush.msra.mxu2 %v532_v24 }
  0x1a   : > { %783 = vmatmul.msk.f32.gmra.mxu0 %vm357_vm0, %v350_v3  ;;  %663 = vmatpush.msra.mxu3 %v620_v55 }
  0x1b   : > { %581 = vmatpush.msra.mxu2 %v531_v25 }
  0x1c   : > { %664 = vmatpush.msra.mxu3 %v619_v57 }
  0x1d   : > { %582 = vmatpush.msra.mxu2 %v530_v26 }
  0x22   : > { %784 = vmatmul.msk.f32.gmra.mxu0 %vm357_vm0, %v351_v4  ;;  %v430_v4 = vld [vmem:[%s1097_s2 + $0x38] sm:$0xff] }
  0x2a   : > { %785 = vmatmul.msk.f32.gmra.mxu0 %vm357_vm0, %v352_v5 }
  0x32   : > { %786 = vmatmul.msk.f32.gmra.mxu0 %vm357_vm0, %v353_v6 }
  0x3a   : > { %787 = vmatmul.msk.f32.gmra.mxu0 %vm357_vm0, %v354_v7 }
  0x42   : > { %788 = vmatmul.msk.f32.gmra.mxu0 %vm357_vm0, %v355_v8 }
  0x4a   : > { %789 = vmatmul.msk.f32.gmra.mxu0 %vm357_vm0, %v356_v9  ;;  %v618_v9 = vld [vmem:[%s1102_s7 + $0x10] sm:$0xff] }
  0x4b   : > { %665 = vmatpush.msra.mxu3 %v618_v9 }
  0x4d   : > { %666 = vmatpush.msra.mxu3 %v617_v10 }
  0x4f   : > { %667 = vmatpush.msra.mxu3 %v616_v15 }
  0x8f   : > { %v941_v11 = vpop.f32.mrf.mxu0 }
  0x90   : > { %791 = vmatmul.msk.f32.vlgmr.msra.gmra.mxu1 %vm432_vm2, %v941_v11 }
  0x97   : > { %v945_v12 = vpop.f32.mrf.mxu0 }
  0x98   : > { %792 = vmatmul.msk.f32.gmra.mxu1 %vm432_vm2, %v945_v12 }
  0x9f   : > { %v949_v13 = vpop.f32.mrf.mxu0 }
  0xa0   : > { %793 = vmatmul.msk.f32.gmra.mxu1 %vm432_vm2, %v949_v13 }
  0xa7   : > { %v953_v14 = vpop.f32.mrf.mxu0 }
  0xa8   : > { %794 = vmatmul.msk.f32.gmra.mxu1 %vm432_vm2, %v953_v14 }
  0xaf   : > { %v969_v19 = vpop.f32.mrf.mxu0 }
  0xb0   : > { %795 = vmatmul.msk.f32.gmra.mxu1 %vm432_vm2, %v969_v19 }
  0xb7   : > { %v973_v20 = vpop.f32.mrf.mxu0 }
  0xb8   : > { %796 = vmatmul.msk.f32.gmra.mxu1 %vm432_vm2, %v973_v20 }
  0xbf   : > { %v977_v21 = vpop.f32.mrf.mxu0 }
  0xc0   : > { %797 = vmatmul.msk.f32.gmra.mxu1 %vm432_vm2, %v977_v21 }
  0xc7   : > { %v981_v22 = vpop.f32.mrf.mxu0 }
  0xc8   : > { %798 = vmatmul.msk.f32.gmra.mxu1 %vm432_vm2, %v981_v22 }
 0x10d   : > { %v478_v29 = vpop.f32.mrf.mxu1 }
 0x10e   : > { %v502_v30 = vadd.f32 %v478_v29, %v423_v27 }
 0x110   : > { %v514_v31 = vadd.f32 %v827_v28, %v502_v30 }
 0x112   : > { %v522_v32 = vmax.f32 %v514_v31, 0.0 }
 0x114   : > { %799 = vmatmul.msk.f32.vlgmr.msra.gmra.mxu2 %vm542_vm3, %v522_v32 }
 0x115   : > { %v481_v34 = vpop.f32.mrf.mxu1 }
 0x116   : > { %v503_v35 = vadd.f32 %v481_v34, %v424_v33 }
 0x118   : > { %v515_v36 = vadd.f32 %v827_v28, %v503_v35 }
 0x11a   : > { %v523_v37 = vmax.f32 %v515_v36, 0.0 }
 0x11c   : > { %800 = vmatmul.msk.f32.gmra.mxu2 %vm542_vm3, %v523_v37 }
 0x11d   : > { %v484_v39 = vpop.f32.mrf.mxu1 }
 0x11e   : > { %v504_v40 = vadd.f32 %v484_v39, %v425_v38 }
 0x120   : > { %v516_v41 = vadd.f32 %v827_v28, %v504_v40 }
 0x122   : > { %v524_v42 = vmax.f32 %v516_v41, 0.0 }
 0x124   : > { %801 = vmatmul.msk.f32.gmra.mxu2 %vm542_vm3, %v524_v42 }
 0x125   : > { %v487_v44 = vpop.f32.mrf.mxu1 }
 0x126   : > { %v505_v45 = vadd.f32 %v487_v44, %v426_v43 }
 0x128   : > { %v517_v46 = vadd.f32 %v827_v28, %v505_v45  ;;  %v829_v45 = vld [vmem:[%s1103_s8] ss:$0 sm:$0xff] }
 0x12a   : > { %v525_v47 = vmax.f32 %v517_v46, 0.0 }
 0x12c   : > { %802 = vmatmul.msk.f32.gmra.mxu2 %vm542_vm3, %v525_v47 }
 0x12d   : > { %v490_v51 = vpop.f32.mrf.mxu1 }
 0x12e   : > { %v506_v52 = vadd.f32 %v490_v51, %v427_v48 }
 0x130   : > { %v518_v54 = vadd.f32 %v827_v28, %v506_v52 }
 0x132   : > { %v526_v56 = vmax.f32 %v518_v54, 0.0 }
 0x134   : > { %803 = vmatmul.msk.f32.gmra.mxu2 %vm542_vm3, %v526_v56 }
 0x135   : > { %v493_v59 = vpop.f32.mrf.mxu1 }
 0x136   : > { %v507_v60 = vadd.f32 %v493_v59, %v428_v58 }
 0x138   : > { %v519_v61 = vadd.f32 %v827_v28, %v507_v60 }
 0x13a   : > { %v527_v62 = vmax.f32 %v519_v61, 0.0 }
 0x13c   : > { %804 = vmatmul.msk.f32.gmra.mxu2 %vm542_vm3, %v527_v62 }
 0x13d   : > { %v496_v0 = vpop.f32.mrf.mxu1 }
 0x13e   : > { %v508_v1 = vadd.f32 %v496_v0, %v429_v63 }
 0x140   : > { %v520_v2 = vadd.f32 %v827_v28, %v508_v1 }
 0x142   : > { %v528_v3 = vmax.f32 %v520_v2, 0.0 }
 0x144   : > { %805 = vmatmul.msk.f32.gmra.mxu2 %vm542_vm3, %v528_v3 }
 0x145   : > { %v499_v5 = vpop.f32.mrf.mxu1 }
 0x146   : > { %v509_v6 = vadd.f32 %v499_v5, %v430_v4 }
 0x148   : > { %v521_v7 = vadd.f32 %v827_v28, %v509_v6 }
 0x14a   : > { %v529_v8 = vmax.f32 %v521_v7, 0.0 }
 0x14c   : > { %806 = vmatmul.msk.f32.gmra.mxu2 %vm542_vm3, %v529_v8 }
 0x197   : > { %v584_v17 = vpop.f32.mrf.mxu2 }
 0x198   : > { %v585_v18 = vadd.f32 %v828_v16, %v584_v17 }
 0x19a   : > { %v608_v23 = vmax.f32 %v585_v18, 0.0 }
 0x19c   : > { %807 = vmatmul.msk.f32.vlgmr.msra.gmra.mxu3 %vm542_vm3, %v608_v23 }
 0x19f   : > { %v587_v24 = vpop.f32.mrf.mxu2 }
 0x1a0   : > { %v588_v25 = vadd.f32 %v828_v16, %v587_v24 }
 0x1a2   : > { %v609_v26 = vmax.f32 %v588_v25, 0.0 }
 0x1a4   : > { %808 = vmatmul.msk.f32.gmra.mxu3 %vm542_vm3, %v609_v26 }
 0x1a7   : > { %v590_v27 = vpop.f32.mrf.mxu2 }
 0x1a8   : > { %v591_v28 = vadd.f32 %v828_v16, %v590_v27 }
 0x1aa   : > { %v610_v29 = vmax.f32 %v591_v28, 0.0 }
 0x1ac   : > { %809 = vmatmul.msk.f32.gmra.mxu3 %vm542_vm3, %v610_v29 }
 0x1af   : > { %v593_v30 = vpop.f32.mrf.mxu2 }
 0x1b0   : > { %v594_v31 = vadd.f32 %v828_v16, %v593_v30 }
 0x1b2   : > { %v611_v32 = vmax.f32 %v594_v31, 0.0 }
 0x1b4   : > { %810 = vmatmul.msk.f32.gmra.mxu3 %vm542_vm3, %v611_v32 }
 0x1b7   : > { %v596_v33 = vpop.f32.mrf.mxu2 }
 0x1b8   : > { %v597_v34 = vadd.f32 %v828_v16, %v596_v33 }
 0x1ba   : > { %v612_v35 = vmax.f32 %v597_v34, 0.0 }
 0x1bc   : > { %811 = vmatmul.msk.f32.gmra.mxu3 %vm542_vm3, %v612_v35 }
 0x1bf   : > { %v599_v36 = vpop.f32.mrf.mxu2 }
 0x1c0   : > { %v600_v37 = vadd.f32 %v828_v16, %v599_v36 }
 0x1c2   : > { %v613_v38 = vmax.f32 %v600_v37, 0.0 }
 0x1c4   : > { %812 = vmatmul.msk.f32.gmra.mxu3 %vm542_vm3, %v613_v38 }
 0x1c7   : > { %v602_v39 = vpop.f32.mrf.mxu2 }
 0x1c8   : > { %v603_v40 = vadd.f32 %v828_v16, %v602_v39 }
 0x1ca   : > { %v614_v41 = vmax.f32 %v603_v40, 0.0 }
 0x1cc   : > { %813 = vmatmul.msk.f32.gmra.mxu3 %vm542_vm3, %v614_v41 }
 0x1cf   : > { %v605_v42 = vpop.f32.mrf.mxu2 }
 0x1d0   : > { %v606_v43 = vadd.f32 %v828_v16, %v605_v42 }
 0x1d2   : > { %v615_v44 = vmax.f32 %v606_v43, 0.0 }
 0x1d4   : > { %814 = vmatmul.msk.f32.gmra.mxu3 %vm542_vm3, %v615_v44 }
 0x21f   : > { %v669_v46 = vpop.f32.mrf.mxu3 }
 0x220   : > { %v670_v47 = vadd.f32 %v829_v45, %v669_v46 }
 0x222   : > { %v693_v48 = vadd.f32 %v670_v47, %v941_v11 }
 0x224   : > { %701 = vst.msk [vmem:[%s346_s19] sm:$0xff] %vm432_vm2, %v693_v48 }
 0x227   : > { %v672_v49 = vpop.f32.mrf.mxu3 }
 0x228   : > { %v673_v50 = vadd.f32 %v829_v45, %v672_v49 }
 0x22a   : > { %v694_v51 = vadd.f32 %v673_v50, %v945_v12 }
 0x22c   : > { %702 = vst.msk [vmem:[%s346_s19 + $0x8] sm:$0xff] %vm432_vm2, %v694_v51 }
 0x22f   : > { %v675_v52 = vpop.f32.mrf.mxu3 }
 0x230   : > { %v676_v53 = vadd.f32 %v829_v45, %v675_v52 }
 0x232   : > { %v695_v54 = vadd.f32 %v676_v53, %v949_v13 }
 0x234   : > { %703 = vst.msk [vmem:[%s346_s19 + $0x10] sm:$0xff] %vm432_vm2, %v695_v54 }
 0x237   : > { %v678_v55 = vpop.f32.mrf.mxu3 }
 0x238   : > { %v679_v56 = vadd.f32 %v829_v45, %v678_v55 }
 0x23a   : > { %v696_v57 = vadd.f32 %v679_v56, %v953_v14 }
 0x23c   : > { %704 = vst.msk [vmem:[%s346_s19 + $0x18] sm:$0xff] %vm432_vm2, %v696_v57 }
 0x23f   : > { %v681_v11 = vpop.f32.mrf.mxu3 }
 0x240   : > { %v682_v58 = vadd.f32 %v829_v45, %v681_v11 }
 0x242   : > { %v697_v59 = vadd.f32 %v682_v58, %v969_v19 }
 0x244   : > { %705 = vst.msk [vmem:[%s346_s19 + $0x20] sm:$0xff] %vm432_vm2, %v697_v59 }
 0x247   : > { %v684_v12 = vpop.f32.mrf.mxu3 }
 0x248   : > { %v685_v60 = vadd.f32 %v829_v45, %v684_v12 }
 0x24a   : > { %v698_v61 = vadd.f32 %v685_v60, %v973_v20 }
 0x24c   : > { %706 = vst.msk [vmem:[%s346_s19 + $0x28] sm:$0xff] %vm432_vm2, %v698_v61 }
 0x24f   : > { %v687_v13 = vpop.f32.mrf.mxu3 }
 0x250   : > { %v688_v62 = vadd.f32 %v829_v45, %v687_v13 }
 0x252   : > { %v699_v63 = vadd.f32 %v688_v62, %v977_v21 }
 0x254   : > { %707 = vst.msk [vmem:[%s346_s19 + $0x30] sm:$0xff] %vm432_vm2, %v699_v63 }
 0x257   : > { %v690_v14 = vpop.f32.mrf.mxu3 }
 0x258   : > { %v691_v0 = vadd.f32 %v829_v45, %v690_v14 }
 0x25a   : > { %v700_v1 = vadd.f32 %v691_v0, %v981_v22 }
 0x25c   : > { %708 = vst.msk [vmem:[%s346_s19 + $0x38] sm:$0xff] %vm432_vm2, %v700_v1 }
 0x25d PF: > { %s19_s30 = sadd.s32 1, %s836_s30  }
 0x25e   : > { %p16_p4 = scmp.ge.s32.totalorder %s19_s30, 4  }
 0x260   :  { %18 = sbr.rel (!%p16_p4) target bundleno = 1 (0x1), region = 89 }

// kernel: trans_forward.2
= control target key start
LH: loop header
LB: loop body
LE: loop exit
PB: predicated region body
PF: predicated region fallthrough
CT: control target
= control target key end

     0   :  { %s963_s21 = smov 0   ;;  %s1176_s0 = inlined_call_operand.vmem [shape: f32[2,64,3], index: 0, kind: input, shape index: {}]   ;;  %s1177_s1 = inlined_call_operand.vmem [shape: f32[3,64], index: 1, kind: input, shape index: {}]   ;;  %s1178_s2 = inlined_call_operand.vmem [shape: f32[1,64], index: 2, kind: input, shape index: {}]   ;;  %s1179_s3 = inlined_call_operand.vmem [shape: f32[64,128], index: 3, kind: input, shape index: {}]   ;;  %s1180_s4 = inlined_call_operand.vmem [shape: f32[1,128], index: 4, kind: input, shape index: {}]   ;;  %s1181_s5 = inlined_call_operand.vmem [shape: f32[128,32], index: 5, kind: input, shape index: {}]   ;;  %s1182_s6 = inlined_call_operand.vmem [shape: f32[1,32], index: 6, kind: input, shape index: {}]   ;;  %s1183_s7 = inlined_call_operand.vmem [shape: f32[32,192], index: 7, kind: input, shape index: {}]   ;;  %s1184_s8 = inlined_call_operand.vmem [shape: f32[1,192], index: 8, kind: input, shape index: {}]   ;;  %s1185_s9 = inlined_call_operand.vmem [shape: f32[128,56], index: 9, kind: input, shape index: {}]   ;;  %s1186_s10 = inlined_call_operand.vmem [shape: f32[1,56], index: 10, kind: input, shape index: {}]   ;;  %s1187_s11 = inlined_call_operand.vmem [shape: f32[2,1,56], index: 11, kind: output, shape index: {0}]   ;;  %s1188_s12 = inlined_call_operand.vmem [shape: f32[2,1,64], index: 12, kind: output, shape index: {1}]  }
   0x1 LB: > { %s850_s22 = sadd.s32 4294967295, %s896_s21   ;;  %p854_p0 = scmp.ge.s32.totalorder %s896_s21, 1  ;;  %s896_s21 = sphi %s963_s21, %s23_s21  }
   0x2   : > { %p365_p1 = scmp.lt.s32.totalorder %s896_s21, 3 }
   0x4   : > { %p366_p2 = pnand %p854_p0, %p365_p1 }
   0x5   : > { %p408_p3 = scmp.lt.s32.totalorder (!%p366_p2), %s850_s22, 1 }
   0x6   : > { %369 = sbr.rel (%p366_p2) target bundleno = 755 (0x2f3), region = 64 }
   0xb   : > { %v427_v0 = vld [vmem:[%s1177_s1] sm:$0x7]  ;;  %vm457_vm0 = vcmask 1042432   ;;  %s1190_s22 = smov (!%p408_p3, %s850_s22), 1  ;;  %vm432_vm1 = vcmask 23552   ;;  %v517_v5 = vld [vmem:[%s1179_s3 + $0x38] sm:$0xff] }
   0xc   : > { %857 = vmatpush.msk.msra.mxu0 %vm457_vm0, %v427_v0  ;;  %s878_s25 = sshll.u32 %s1190_s22, 6  ;;  %v516_v6 = vld [vmem:[%s1179_s3 + $0x30] sm:$0xff]  ;;  %555 = vmatpush.msra.mxu1 %v517_v5  ;;  %v515_v7 = vld [vmem:[%s1179_s3 + $0x28] sm:$0xff]  ;;  %v514_v8 = vld [vmem:[%s1179_s3 + $0x20] sm:$0xff]  ;;  %vm522_vm2 = vcmask 523264   ;;  %vm657_vm3 = vcmask 261120   ;;  %s418_s23 = scalar_lea.vmem %s1188_s12, %s1190_s22 }
   0xd   : > { %s412_s28 = scalar_lea.vmem %s1176_s0, %s878_s25  ;;  %v513_v10 = vld [vmem:[%s1179_s3 + $0x18] sm:$0xff]  ;;  %v512_v14 = vld [vmem:[%s1179_s3 + $0x10] sm:$0xff]  ;;  %v511_v15 = vld [vmem:[%s1179_s3 + $0x8] sm:$0xff]  ;;  %vm737_vm4 = vcmask 516096   ;;  %s415_s29 = scalar_lea.vmem %s1187_s11, %s1190_s22  ;;  %vm776_vm5 = vcmask 450560  }
   0xe   : > { %v419_v1 = vld [vmem:[%s412_s28] sm:$0xff]  ;;  %v420_v2 = vld [vmem:[%s412_s28 + $0x8] sm:$0xff]  ;;  %v421_v3 = vld [vmem:[%s412_s28 + $0x10] sm:$0xff]  ;;  %556 = vmatpush.msra.mxu1 %v516_v6 }
   0xf   : > { %858 = vmatmul.msk.f32.vlgmr.msra.gmra.mxu0 %vm432_vm1, %v419_v1  ;;  %v422_v4 = vld [vmem:[%s412_s28 + $0x18] sm:$0xff]  ;;  %v423_v9 = vld [vmem:[%s412_s28 + $0x20] sm:$0xff]  ;;  %v424_v11 = vld [vmem:[%s412_s28 + $0x28] sm:$0xff] }
  0x10   : > { %557 = vmatpush.msra.mxu1 %v515_v7  ;;  %v425_v12 = vld [vmem:[%s412_s28 + $0x30] sm:$0xff]  ;;  %v426_v13 = vld [vmem:[%s412_s28 + $0x38] sm:$0xff]  ;;  %v510_v16 = vld [vmem:[%s1179_s3] sm:$0xff] }
  0x11   : > { %v887_v17 = vld [vmem:[%s1178_s2] ss:$0 sm:$0xff]  ;;  %v611_v30 = vld [vmem:[%s1181_s5 + $0x78] sm:$0xff]  ;;  %v610_v31 = vld [vmem:[%s1181_s5 + $0x70] sm:$0xff] }
  0x12   : > { %558 = vmatpush.msra.mxu1 %v514_v8  ;;  %616 = vmatpush.msra.mxu2 %v611_v30  ;;  %v609_v32 = vld [vmem:[%s1181_s5 + $0x68] sm:$0xff]  ;;  %v608_v35 = vld [vmem:[%s1181_s5 + $0x60] sm:$0xff]  ;;  %v607_v37 = vld [vmem:[%s1181_s5 + $0x58] sm:$0xff] }
  0x13   : > { %v606_v38 = vld [vmem:[%s1181_s5 + $0x50] sm:$0xff]  ;;  %v605_v39 = vld [vmem:[%s1181_s5 + $0x48] sm:$0xff]  ;;  %v604_v42 = vld [vmem:[%s1181_s5 + $0x40] sm:$0xff] }
  0x14   : > { %559 = vmatpush.msra.mxu1 %v513_v10  ;;  %617 = vmatpush.msra.mxu2 %v610_v31  ;;  %v603_v44 = vld [vmem:[%s1181_s5 + $0x38] sm:$0xff]  ;;  %v602_v45 = vld [vmem:[%s1181_s5 + $0x30] sm:$0xff]  ;;  %v601_v46 = vld [vmem:[%s1181_s5 + $0x28] sm:$0xff] }
  0x15   : > { %v600_v49 = vld [vmem:[%s1181_s5 + $0x20] sm:$0xff]  ;;  %v599_v51 = vld [vmem:[%s1181_s5 + $0x18] sm:$0xff]  ;;  %v598_v55 = vld [vmem:[%s1181_s5 + $0x10] sm:$0xff] }
  0x16   : > { %560 = vmatpush.msra.mxu1 %v512_v14  ;;  %618 = vmatpush.msra.mxu2 %v609_v32  ;;  %v597_v56 = vld [vmem:[%s1181_s5 + $0x8] sm:$0xff]  ;;  %v596_v57 = vld [vmem:[%s1181_s5] sm:$0xff]  ;;  %v682_v32 = vld [vmem:[%s1183_s7 + $0x18] sm:$0xff] }
  0x17   : > { %859 = vmatmul.msk.f32.gmra.mxu0 %vm432_vm1, %v420_v2  ;;  %v888_v58 = vld [vmem:[%s1180_s4] ss:$0 sm:$0xff]  ;;  %v684_v30 = vld [vmem:[%s1183_s7 + $0x28] sm:$0xff] }
  0x18   : > { %561 = vmatpush.msra.mxu1 %v511_v15  ;;  %619 = vmatpush.msra.mxu2 %v608_v35 }
  0x1a   : > { %562 = vmatpush.msra.mxu1 %v510_v16  ;;  %620 = vmatpush.msra.mxu2 %v607_v37 }
  0x1c   : > { %621 = vmatpush.msra.mxu2 %v606_v38 }
  0x1e   : > { %622 = vmatpush.msra.mxu2 %v605_v39 }
  0x1f   : > { %860 = vmatmul.msk.f32.gmra.mxu0 %vm432_vm1, %v421_v3 }
  0x20   : > { %623 = vmatpush.msra.mxu2 %v604_v42 }
  0x22   : > { %624 = vmatpush.msra.mxu2 %v603_v44 }
  0x24   : > { %625 = vmatpush.msra.mxu2 %v602_v45 }
  0x26   : > { %626 = vmatpush.msra.mxu2 %v601_v46 }
  0x27   : > { %861 = vmatmul.msk.f32.gmra.mxu0 %vm432_vm1, %v422_v4 }
  0x28   : > { %627 = vmatpush.msra.mxu2 %v600_v49 }
  0x2a   : > { %628 = vmatpush.msra.mxu2 %v599_v51 }
  0x2c   : > { %629 = vmatpush.msra.mxu2 %v598_v55 }
  0x2e   : > { %630 = vmatpush.msra.mxu2 %v597_v56 }
  0x2f   : > { %862 = vmatmul.msk.f32.gmra.mxu0 %vm432_vm1, %v423_v9 }
  0x30   : > { %631 = vmatpush.msra.mxu2 %v596_v57 }
  0x37   : > { %863 = vmatmul.msk.f32.gmra.mxu0 %vm432_vm1, %v424_v11 }
  0x3f   : > { %864 = vmatmul.msk.f32.gmra.mxu0 %vm432_vm1, %v425_v12 }
  0x47   : > { %865 = vmatmul.msk.f32.gmra.mxu0 %vm432_vm1, %v426_v13 }
  0x8c   : > { %v478_v18 = vpop.f32.mrf.mxu0 }
  0x8d   : > { %v479_v19 = vadd.f32 %v887_v17, %v478_v18 }
  0x8f   : > { %v502_v20 = vmax.f32 %v479_v19, 0.0 }
  0x91   : > { %866 = vmatmul.msk.f32.vlgmr.msra.gmra.mxu1 %vm522_vm2, %v502_v20 }
  0x94   : > { %v481_v21 = vpop.f32.mrf.mxu0 }
  0x95   : > { %v482_v22 = vadd.f32 %v887_v17, %v481_v21 }
  0x97   : > { %v503_v23 = vmax.f32 %v482_v22, 0.0 }
  0x99   : > { %867 = vmatmul.msk.f32.gmra.mxu1 %vm522_vm2, %v503_v23 }
  0x9c   : > { %v484_v24 = vpop.f32.mrf.mxu0 }
  0x9d   : > { %v485_v25 = vadd.f32 %v887_v17, %v484_v24  ;;  %v685_v24 = vld [vmem:[%s1183_s7 + $0x30] sm:$0xff] }
  0x9e   : > { %708 = vmatpush.msra.mxu3 %v685_v24 }
  0x9f   : > { %v504_v26 = vmax.f32 %v485_v25, 0.0  ;;  %v683_v25 = vld [vmem:[%s1183_s7 + $0x20] sm:$0xff] }
  0xa0   : > { %709 = vmatpush.msra.mxu3 %v683_v25  ;;  %v755_v25 = vld [vmem:[%s1186_s10] sm:$0x1] }
  0xa1   : > { %868 = vmatmul.msk.f32.gmra.mxu1 %vm522_vm2, %v504_v26  ;;  %v681_v26 = vld [vmem:[%s1183_s7 + $0x10] sm:$0xff] }
  0xa2   : > { %710 = vmatpush.msra.mxu3 %v681_v26 }
  0xa4   : > { %v487_v27 = vpop.f32.mrf.mxu0 }
  0xa5   : > { %v488_v28 = vadd.f32 %v887_v17, %v487_v27  ;;  %v679_v27 = vld [vmem:[%s1183_s7] sm:$0xff] }
  0xa6   : > { %711 = vmatpush.msra.mxu3 %v679_v27 }
  0xa7   : > { %v505_v29 = vmax.f32 %v488_v28, 0.0 }
  0xa9   : > { %869 = vmatmul.msk.f32.gmra.mxu1 %vm522_vm2, %v505_v29  ;;  %v686_v29 = vld [vmem:[%s1183_s7 + $0x38] sm:$0xff] }
  0xaa   : > { %728 = vmatpush.msrb.mxu3 %v686_v29 }
  0xac   : > { %v490_v33 = vpop.f32.mrf.mxu0  ;;  %729 = vmatpush.msrb.mxu3 %v684_v30 }
  0xad   : > { %v491_v34 = vadd.f32 %v887_v17, %v490_v33  ;;  %v889_v33 = vld [vmem:[%s1182_s6] ss:$0 sm:$0xff] }
  0xae   : > { %730 = vmatpush.msrb.mxu3 %v682_v32 }
  0xaf   : > { %v506_v36 = vmax.f32 %v491_v34, 0.0  ;;  %v680_v34 = vld [vmem:[%s1183_s7 + $0x8] sm:$0xff] }
  0xb0   : > { %731 = vmatpush.msrb.mxu3 %v680_v34 }
  0xb1   : > { %870 = vmatmul.msk.f32.gmra.mxu1 %vm522_vm2, %v506_v36 }
  0xb4   : > { %v493_v40 = vpop.f32.mrf.mxu0 }
  0xb5   : > { %v494_v41 = vadd.f32 %v887_v17, %v493_v40 }
  0xb7   : > { %v507_v43 = vmax.f32 %v494_v41, 0.0 }
  0xb9   : > { %871 = vmatmul.msk.f32.gmra.mxu1 %vm522_vm2, %v507_v43 }
  0xbc   : > { %v496_v47 = vpop.f32.mrf.mxu0 }
  0xbd   : > { %v497_v48 = vadd.f32 %v887_v17, %v496_v47 }
  0xbf   : > { %v508_v50 = vmax.f32 %v497_v48, 0.0 }
  0xc1   : > { %872 = vmatmul.msk.f32.gmra.mxu1 %vm522_vm2, %v508_v50 }
  0xc4   : > { %v499_v52 = vpop.f32.mrf.mxu0 }
  0xc5   : > { %v500_v53 = vadd.f32 %v887_v17, %v499_v52 }
  0xc7   : > { %v509_v54 = vmax.f32 %v500_v53, 0.0 }
  0xc9   : > { %873 = vmatmul.msk.f32.gmra.mxu1 %vm522_vm2, %v509_v54 }
 0x10e   : > { %v564_v59 = vpop.f32.mrf.mxu1 }
 0x10f   : > { %v565_v60 = vadd.f32 %v888_v58, %v564_v59 }
 0x111   : > { %v588_v61 = vmax.f32 %v565_v60, 0.0 }
 0x113   : > { %632 = vmatmul.f32.vlgmr.msra.gmra.mxu2 %v588_v61 }
 0x116   : > { %v567_v62 = vpop.f32.mrf.mxu1 }
 0x117   : > { %v568_v63 = vadd.f32 %v888_v58, %v567_v62 }
 0x119   : > { %v589_v0 = vmax.f32 %v568_v63, 0.0 }
 0x11b   : > { %635 = vmatmul.f32.gmra.mxu2 %v589_v0 }
 0x11e   : > { %v570_v1 = vpop.f32.mrf.mxu1 }
 0x11f   : > { %v571_v2 = vadd.f32 %v888_v58, %v570_v1  ;;  %v754_v1 = vld [vmem:[%s1185_s9 + $0x78] sm:$0xff] }
 0x121   : > { %v590_v3 = vmax.f32 %v571_v2, 0.0  ;;  %v753_v2 = vld [vmem:[%s1185_s9 + $0x70] sm:$0xff] }
 0x123   : > { %638 = vmatmul.f32.gmra.mxu2 %v590_v3  ;;  %v752_v3 = vld [vmem:[%s1185_s9 + $0x68] sm:$0xff] }
 0x126   : > { %v573_v4 = vpop.f32.mrf.mxu1 }
 0x127   : > { %v574_v5 = vadd.f32 %v888_v58, %v573_v4  ;;  %v751_v4 = vld [vmem:[%s1185_s9 + $0x60] sm:$0xff] }
 0x129   : > { %v591_v6 = vmax.f32 %v574_v5, 0.0  ;;  %v750_v5 = vld [vmem:[%s1185_s9 + $0x58] sm:$0xff] }
 0x12b   : > { %641 = vmatmul.f32.gmra.mxu2 %v591_v6  ;;  %v749_v6 = vld [vmem:[%s1185_s9 + $0x50] sm:$0xff] }
 0x12e   : > { %v576_v7 = vpop.f32.mrf.mxu1 }
 0x12f   : > { %v577_v8 = vadd.f32 %v888_v58, %v576_v7  ;;  %v748_v7 = vld [vmem:[%s1185_s9 + $0x48] sm:$0xff] }
 0x131   : > { %v592_v9 = vmax.f32 %v577_v8, 0.0  ;;  %v747_v8 = vld [vmem:[%s1185_s9 + $0x40] sm:$0xff] }
 0x133   : > { %644 = vmatmul.f32.gmra.mxu2 %v592_v9  ;;  %v746_v9 = vld [vmem:[%s1185_s9 + $0x38] sm:$0xff] }
 0x136   : > { %v579_v10 = vpop.f32.mrf.mxu1 }
 0x137   : > { %v580_v11 = vadd.f32 %v888_v58, %v579_v10  ;;  %v745_v10 = vld [vmem:[%s1185_s9 + $0x30] sm:$0xff] }
 0x139   : > { %v593_v12 = vmax.f32 %v580_v11, 0.0  ;;  %v744_v11 = vld [vmem:[%s1185_s9 + $0x28] sm:$0xff] }
 0x13b   : > { %647 = vmatmul.f32.gmra.mxu2 %v593_v12  ;;  %v743_v12 = vld [vmem:[%s1185_s9 + $0x20] sm:$0xff] }
 0x13e   : > { %v582_v13 = vpop.f32.mrf.mxu1 }
 0x13f   : > { %v583_v14 = vadd.f32 %v888_v58, %v582_v13  ;;  %v742_v13 = vld [vmem:[%s1185_s9 + $0x18] sm:$0xff] }
 0x141   : > { %v594_v15 = vmax.f32 %v583_v14, 0.0  ;;  %v741_v14 = vld [vmem:[%s1185_s9 + $0x10] sm:$0xff] }
 0x143   : > { %650 = vmatmul.f32.gmra.mxu2 %v594_v15  ;;  %v740_v15 = vld [vmem:[%s1185_s9 + $0x8] sm:$0xff] }
 0x146   : > { %v585_v16 = vpop.f32.mrf.mxu1 }
 0x147   : > { %v586_v17 = vadd.f32 %v888_v58, %v585_v16  ;;  %v739_v16 = vld [vmem:[%s1185_s9] sm:$0xff] }
 0x149   : > { %v595_v18 = vmax.f32 %v586_v17, 0.0  ;;  %v687_v17 = vld [vmem:[%s1184_s8] sm:$0x3] }
 0x14b   : > { %653 = vmatmul.f32.gmra.mxu2 %v595_v18  ;;  %v689_v18 = vperm.slane %v687_v17, 0 }
 0x196   : > { %v633_v19 = vpop.f32.mrf.mxu2 }
 0x197   : > { %v634_v39 = vadd.f32 %v889_v33, %v633_v19 }
 0x199   : > { %v658_v49 = vsel %vm657_vm3, %v634_v39, -inf }
 0x19e   : > { %v636_v20 = vpop.f32.mrf.mxu2 }
 0x19f   : > { %v637_v36 = vadd.f32 %v889_v33, %v636_v20 }
 0x1a1   : > { %v659_v44 = vsel %vm657_vm3, %v637_v36, -inf }
 0x1a6   : > { %v639_v21 = vpop.f32.mrf.mxu2 }
 0x1a7   : > { %v640_v40 = vadd.f32 %v889_v33, %v639_v21 }
 0x1a9   : > { %v660_v50 = vsel %vm657_vm3, %v640_v40, -inf }
 0x1ae   : > { %v642_v22 = vpop.f32.mrf.mxu2 }
 0x1af   : > { %v643_v41 = vadd.f32 %v889_v33, %v642_v22  ;;  %v690_v22 = vperm.slane %v687_v17, 1 }
 0x1b1   : > { %v661_v51 = vsel %vm657_vm3, %v643_v41, -inf }
 0x1b6   : > { %v645_v23 = vpop.f32.mrf.mxu2 }
 0x1b7   : > { %v646_v37 = vadd.f32 %v889_v33, %v645_v23 }
 0x1b9   : > { %v662_v45 = vsel %vm657_vm3, %v646_v37, -inf }
 0x1ba   : > { %v663_v53 = vmax.f32 %v658_v49, %v662_v45 }
 0x1be   : > { %v648_v28 = vpop.f32.mrf.mxu2 }
 0x1bf   : > { %v649_v35 = vadd.f32 %v889_v33, %v648_v28 }
 0x1c1   : > { %v664_v42 = vsel %vm657_vm3, %v649_v35, -inf }
 0x1c2   : > { %v665_v48 = vmax.f32 %v659_v44, %v664_v42 }
 0x1c4   : > { %v670_v56 = vmax.f32 %v663_v53, %v665_v48 }
 0x1c6   : > { %v651_v31 = vpop.f32.mrf.mxu2 }
 0x1c7   : > { %v652_v38 = vadd.f32 %v889_v33, %v651_v31 }
 0x1c9   : > { %v666_v46 = vsel %vm657_vm3, %v652_v38, -inf }
 0x1ca   : > { %v667_v54 = vmax.f32 %v660_v50, %v666_v46 }
 0x1ce   : > { %v654_v43 = vpop.f32.mrf.mxu2 }
 0x1cf   : > { %v655_v47 = vadd.f32 %v889_v33, %v654_v43 }
 0x1d1   : > { %v668_v52 = vsel %vm657_vm3, %v655_v47, -inf }
 0x1d2   : > { %v669_v55 = vmax.f32 %v661_v51, %v668_v52 }
 0x1d4   : > { %v671_v57 = vmax.f32 %v667_v54, %v669_v55 }
 0x1d6   : > { %v672_v58 = vmax.f32 %v670_v56, %v671_v57 }
 0x1d8   : > { %v673_v59 = vrot.slane %v672_v58, 4 }
 0x1da   : > { %v674_v60 = vmax.f32 %v672_v58, %v673_v59 }
 0x1dc   : > { %v675_v61 = vrot.slane %v674_v60, 2 }
 0x1de   : > { %v676_v62 = vmax.f32 %v674_v60, %v675_v61 }
 0x1e0   : > { %v677_v63 = vrot.slane %v676_v62, 1 }
 0x1e2   : > { %v678_v0 = vmax.f32 %v676_v62, %v677_v63 }
 0x1e4   : > { %874 = vmatmul.msk.f32.vlgmr.msra.gmra.mxu3 %vm657_vm3, %v678_v0 }
 0x1e5   : > { %756 = vmatpush.msra.mxu3 %v754_v1 }
 0x1e7   : > { %757 = vmatpush.msra.mxu3 %v753_v2 }
 0x1e9   : > { %758 = vmatpush.msra.mxu3 %v752_v3 }
 0x1eb   : > { %759 = vmatpush.msra.mxu3 %v751_v4 }
 0x1ec   : > { %875 = vmatmul.msk.f32.vlgmr.msrb.gmra.mxu3 %vm657_vm3, %v678_v0 }
 0x1ed   : > { %760 = vmatpush.msra.mxu3 %v750_v5 }
 0x1ef   : > { %761 = vmatpush.msra.mxu3 %v749_v6 }
 0x1f1   : > { %762 = vmatpush.msra.mxu3 %v748_v7 }
 0x1f3   : > { %763 = vmatpush.msra.mxu3 %v747_v8 }
 0x1f5   : > { %764 = vmatpush.msra.mxu3 %v746_v9 }
 0x1f7   : > { %765 = vmatpush.msra.mxu3 %v745_v10 }
 0x1f9   : > { %766 = vmatpush.msra.mxu3 %v744_v11 }
 0x1fb   : > { %767 = vmatpush.msra.mxu3 %v743_v12 }
 0x1fd   : > { %768 = vmatpush.msra.mxu3 %v742_v13 }
 0x1ff   : > { %769 = vmatpush.msra.mxu3 %v741_v14 }
 0x201   : > { %770 = vmatpush.msra.mxu3 %v740_v15 }
 0x203   : > { %771 = vmatpush.msra.mxu3 %v739_v16 }
 0x267   : > { %v713_v19 = vpop.f32.mrf.mxu3 }
 0x268   : > { %v714_v20 = vadd.f32 %v713_v19, %v689_v18 }
 0x26a   : > { %v736_v21 = vmax.f32 %v714_v20, 0.0 }
 0x26c   : > { %772 = vmatmul.f32.vlgmr.msra.gmra.mxu3 %v736_v21 }
 0x26f   : > { %v733_v23 = vpop.f32.mrf.mxu3 }
 0x270   : > { %v734_v24 = vadd.f32 %v733_v23, %v690_v22 }
 0x272   : > { %738 = vst.msk [vmem:[%s418_s23] sm:$0x1] %vm737_vm4, %v734_v24 }
 0x2ef   : > { %v773_v26 = vpop.f32.mrf.mxu3 }
 0x2f0   : > { %v774_v27 = vadd.f32 %v773_v26, %v755_v25 }
 0x2f2   : > { %777 = vst.msk [vmem:[%s415_s29] sm:$0x1] %vm776_vm5, %v774_v27 }
 0x2f3 PF: > { %s23_s21 = sadd.s32 1, %s896_s21  }
 0x2f4   : > { %p20_p4 = scmp.ge.s32.totalorder %s23_s21, 4  }
 0x2f6   :  { %22 = sbr.rel (!%p20_p4) target bundleno = 1 (0x1), region = 106 }

</bundles_post_ra>
